<compile_context>
chip_gen: v6e
topology: v6e:2x2x1
jax: 0.10.0
libtpu: 0.0.40
codegen_flags: <defaults>
</compile_context>

<pallas_src>
import functools

import jax
import jax.numpy as jnp
from jax import lax
from jax.experimental import pallas as pl
from jax.experimental.pallas import tpu as pltpu


def _round_up(x, m):
    return (x + m - 1) // m * m


def _conv_bn_relu_kernel(p_ref, w_ref, bias_ref, o_ref, acc_ref, *, has_relu):
    # p_ref:    (tm, tk)  bf16 im2col patch tile
    # w_ref:    (tk, tn)  bf16 weight tile (BN scale pre-folded into columns)
    # bias_ref: (1,  tn)  f32 folded BN bias
    # o_ref:    (tm, tn)  f32 output tile
    # acc_ref:  (tm, tn)  f32 VMEM accumulator (resident across the K axis)
    @pl.when(pl.program_id(2) == 0)
    def _init():
        acc_ref[...] = jnp.zeros_like(acc_ref)

    acc_ref[...] += jnp.dot(p_ref[...], w_ref[...],
                            preferred_element_type=jnp.float32)

    @pl.when(pl.program_id(2) == pl.num_programs(2) - 1)
    def _finalize():
        y = acc_ref[...] + bias_ref[...]
        if has_relu:
            y = jnp.maximum(y, 0.0)
        o_ref[...] = y.astype(o_ref.dtype)


def _im2col(x_nchw, ksize, stride, pad, dilation):
    N, C, H, W = x_nchw.shape
    kh = kw = ksize
    Ho = (H + 2 * pad - dilation * (kh - 1) - 1) // stride + 1
    Wo = (W + 2 * pad - dilation * (kw - 1) - 1) // stride + 1
    xp = jnp.pad(x_nchw, ((0, 0), (0, 0), (pad, pad), (pad, pad)))
    slices = []
    for dh in range(kh):
        for dw in range(kw):
            h0 = dh * dilation
            w0 = dw * dilation
            sl = xp[:, :, h0:h0 + stride * Ho:stride, w0:w0 + stride * Wo:stride]
            slices.append(sl)  # (N, C, Ho, Wo)
    # (kh*kw, N, C, Ho, Wo) -> (N, Ho, Wo, C, kh*kw) -> (N*Ho*Wo, C*kh*kw)
    stk = jnp.stack(slices, axis=0)
    stk = jnp.transpose(stk, (1, 3, 4, 2, 0))
    patches = stk.reshape(N * Ho * Wo, C * kh * kw)
    return patches, Ho, Wo


def conv_bn_relu(x_nchw, weight, gamma, beta, running_mean, running_var,
                 conv_bias=None, *, ksize, stride, pad, dilation=1,
                 bn_eps=1e-5, has_bn=True, has_relu=True):
    N, Cin, H, W = x_nchw.shape
    Cout = weight.shape[0]
    kh = kw = ksize

    patches, Ho, Wo = _im2col(x_nchw, ksize, stride, pad, dilation)
    M, K = patches.shape

    # (Cout, Cin, kh, kw) -> (Cin*kh*kw, Cout); K ordering matches im2col (c, dh, dw).
    w_mat = jnp.transpose(weight, (1, 2, 3, 0)).reshape(K, Cout).astype(jnp.float32)

    # Fold eval-mode BN into per-channel scale/bias; fold the scale into the
    # weight columns so the kernel epilogue is only (+bias, ReLU).
    if has_bn:
        scale = gamma / jnp.sqrt(running_var + bn_eps)
        bias = beta - running_mean * scale
        if conv_bias is not None:
            bias = bias + conv_bias * scale
    else:
        scale = jnp.ones((Cout,), jnp.float32)
        bias = (conv_bias.astype(jnp.float32) if conv_bias is not None
                else jnp.zeros((Cout,), jnp.float32))
    w_mat = w_mat * scale[None, :].astype(jnp.float32)

    # ---- tile sizes & lane-dense padding -----------------------------------
    LANE = 128
    Cout_pad = _round_up(Cout, LANE)
    tn = 256 if Cout_pad % 256 == 0 else 128        # MXU-friendly output width

    tm = min(256, _round_up(M, 8))                  # M tile (sweep 256/512 in prod)
    M_pad = _round_up(M, tm)

    if K > 1024:                                    # tile the reduction when large
        tk = 512
        K_pad = _round_up(K, tk)
    else:                                           # single K step; full-dim block
        tk = K_pad = K

    patches_p = jnp.pad(patches, ((0, M_pad - M), (0, K_pad - K)))
    w_p = jnp.pad(w_mat, ((0, K_pad - K), (0, Cout_pad - Cout)))
    bias_p = jnp.pad(bias.astype(jnp.float32).reshape(1, Cout),
                     ((0, 0), (0, Cout_pad - Cout)))

    # bf16 matmul operands (MXU peak, half the HBM traffic); f32 accumulation.
    patches_p = patches_p.astype(jnp.bfloat16)
    w_p = w_p.astype(jnp.bfloat16)

    grid = (M_pad // tm, Cout_pad // tn, K_pad // tk)
    kernel = functools.partial(_conv_bn_relu_kernel, has_relu=has_relu)

    out_flat = pl.pallas_call(
        kernel,
        out_shape=jax.ShapeDtypeStruct((M_pad, Cout_pad), jnp.float32),
        grid_spec=pltpu.PrefetchScalarGridSpec(
            num_scalar_prefetch=0,
            grid=grid,
            in_specs=[
                pl.BlockSpec((tm, tk), lambda i, j, k: (i, k)),
                pl.BlockSpec((tk, tn), lambda i, j, k: (k, j)),
                pl.BlockSpec((1, tn), lambda i, j, k: (0, j)),
            ],
            out_specs=pl.BlockSpec((tm, tn), lambda i, j, k: (i, j)),
            scratch_shapes=[pltpu.VMEM((tm, tn), jnp.float32)],
        ),
        compiler_params=pltpu.CompilerParams(
            dimension_semantics=("parallel", "parallel", "arbitrary")),
    )(patches_p, w_p, bias_p)

    out = out_flat[:M, :Cout]
    # TODO(synk): skip this transpose (extra HBM pass) if the consumer takes NHWC.
    out = out.reshape(N, Ho, Wo, Cout).transpose(0, 3, 1, 2)
    return out


if __name__ == "__main__":
    key = jax.random.PRNGKey(0)
    k_x, k_w, k_g, k_b, k_m, k_v = jax.random.split(key, 6)

    # ConvBnRelu(in_planes=4, out_planes=8, ksize=3, stride=1, pad=1)
    N, Cin, H, W = 2, 4, 16, 16
    Cout, ksize, stride, pad = 8, 3, 1, 1

    x = jax.random.normal(k_x, (N, Cin, H, W), jnp.float32)
    weight = jax.random.normal(k_w, (Cout, Cin, ksize, ksize), jnp.float32) * 0.1
    gamma = jax.random.normal(k_g, (Cout,), jnp.float32) * 0.1 + 1.0
    beta = jax.random.normal(k_b, (Cout,), jnp.float32) * 0.1
    running_mean = jax.random.normal(k_m, (Cout,), jnp.float32) * 0.1
    running_var = jax.nn.softplus(jax.random.normal(k_v, (Cout,), jnp.float32)) + 0.5

    conv_fn = jax.jit(functools.partial(
        conv_bn_relu, ksize=ksize, stride=stride, pad=pad))
    out = jax.block_until_ready(conv_fn(
        x, weight, gamma, beta, running_mean, running_var))

    # Reference: XLA conv + folded eval-mode BN + ReLU (all f32).
    ref = lax.conv_general_dilated(
        x, weight, window_strides=(stride, stride),
        padding=((pad, pad), (pad, pad)),
        dimension_numbers=("NCHW", "OIHW", "NCHW"))
    scale = gamma / jnp.sqrt(running_var + 1e-5)
    bias = beta - running_mean * scale
    ref = jnp.maximum(ref * scale[None, :, None, None]
                      + bias[None, :, None, None], 0.0)

    assert out.shape == (N, Cout, H, W), out.shape
    # bf16 matmul operands with f32 accumulation -> relaxed tolerance vs f32 ref.
    max_err = float(jnp.max(jnp.abs(out - ref)))
    assert jnp.allclose(out, ref, atol=5e-2, rtol=5e-2), max_err

    print("KERNEL_OK")
</pallas_src>

<mosaic_0001>
module attributes {stable_mosaic.version = 11 : i64} {
  func.func @_conv_bn_relu_kernel(%arg0: i32, %arg1: i32, %arg2: i32, %arg3: memref<256x36xbf16, #tpu.memory_space<vmem>>, %arg4: memref<36x128xbf16, #tpu.memory_space<vmem>>, %arg5: memref<1x128xf32, #tpu.memory_space<vmem>>, %arg6: memref<256x128xf32, #tpu.memory_space<vmem>>, %arg7: memref<256x128xf32, #tpu.memory_space<vmem>>) attributes {dimension_semantics = [#tpu.dimension_semantics<parallel>, #tpu.dimension_semantics<parallel>, #tpu.dimension_semantics<arbitrary>], iteration_bounds = array<i64: 2, 1, 1>, scalar_prefetch = 0 : i64, scratch_operands = 1 : i64, tpu.core_type = #tpu.core_type<tc>, window_params = [{transform_indices = @transform_0, window_bounds = array<i64: 256, 36>}, {transform_indices = @transform_1, window_bounds = array<i64: 36, 128>}, {transform_indices = @transform_2, window_bounds = array<i64: 1, 128>}, {transform_indices = @transform_3, window_bounds = array<i64: 256, 128>}]} {
    %c0_i32 = arith.constant 0 : i32
    %0 = arith.cmpi eq, %arg2, %c0_i32 : i32
    %1 = arith.extui %0 : i1 to i32
    %c0_i32_0 = arith.constant 0 : i32
    %2 = arith.cmpi ne, %1, %c0_i32_0 : i32
    scf.if %2 {
      %cst_10 = arith.constant 0.000000e+00 : f32
      %12 = vector.broadcast %cst_10 : f32 to vector<256x128xf32>
      %c0_11 = arith.constant 0 : index
      %c0_12 = arith.constant 0 : index
      %13 = vector.load %arg7[%c0_11, %c0_12] : memref<256x128xf32, #tpu.memory_space<vmem>>, vector<256x128xf32>
      tpu.vector_store %arg7[%c0_11, %c0_12], %12 {strides = array<i32>} : memref<256x128xf32, #tpu.memory_space<vmem>>, vector<256x128xf32>,
    } else {
    }
    %c0 = arith.constant 0 : index
    %c0_1 = arith.constant 0 : index
    %3 = vector.load %arg7[%c0, %c0_1] : memref<256x128xf32, #tpu.memory_space<vmem>>, vector<256x128xf32>
    %c0_2 = arith.constant 0 : index
    %c0_3 = arith.constant 0 : index
    %4 = vector.load %arg3[%c0_2, %c0_3] : memref<256x36xbf16, #tpu.memory_space<vmem>>, vector<256x36xbf16>
    %c0_4 = arith.constant 0 : index
    %c0_5 = arith.constant 0 : index
    %5 = vector.load %arg4[%c0_4, %c0_5] : memref<36x128xbf16, #tpu.memory_space<vmem>>, vector<36x128xbf16>
    %cst = arith.constant dense<0.000000e+00> : vector<256x128xf32>
    %6 = tpu.matmul %4, %5, %cst {dimension_numbers = #tpu.dot_dimension_numbers<[1], [0], [0], [1], [0, 0, 1, 1], [], []>} : vector<256x36xbf16>, vector<36x128xbf16>, vector<256x128xf32> -> vector<256x128xf32>
    %7 = arith.addf %3, %6 : vector<256x128xf32>
    %c0_6 = arith.constant 0 : index
    %c0_7 = arith.constant 0 : index
    %8 = vector.load %arg7[%c0_6, %c0_7] : memref<256x128xf32, #tpu.memory_space<vmem>>, vector<256x128xf32>
    tpu.vector_store %arg7[%c0_6, %c0_7], %7 {strides = array<i32>} : memref<256x128xf32, #tpu.memory_space<vmem>>, vector<256x128xf32>,
    %c0_i32_8 = arith.constant 0 : i32
    %9 = arith.cmpi eq, %arg2, %c0_i32_8 : i32
    %10 = arith.extui %9 : i1 to i32
    %c0_i32_9 = arith.constant 0 : i32
    %11 = arith.cmpi ne, %10, %c0_i32_9 : i32
    scf.if %11 {
      %c0_10 = arith.constant 0 : index
      %c0_11 = arith.constant 0 : index
      %12 = vector.load %arg7[%c0_10, %c0_11] : memref<256x128xf32, #tpu.memory_space<vmem>>, vector<256x128xf32>
      %c0_12 = arith.constant 0 : index
      %c0_13 = arith.constant 0 : index
      %13 = vector.load %arg5[%c0_12, %c0_13] : memref<1x128xf32, #tpu.memory_space<vmem>>, vector<1x128xf32>
      %14 = vector.broadcast %13 : vector<1x128xf32> to vector<256x128xf32>
      %15 = arith.addf %12, %14 : vector<256x128xf32>
      %cst_14 = arith.constant 0.000000e+00 : f32
      %16 = vector.broadcast %cst_14 : f32 to vector<256x128xf32>
      %17 = arith.maximumf %15, %16 : vector<256x128xf32>
      %c0_15 = arith.constant 0 : index
      %c0_16 = arith.constant 0 : index
      %18 = vector.load %arg6[%c0_15, %c0_16] : memref<256x128xf32, #tpu.memory_space<vmem>>, vector<256x128xf32>
      tpu.vector_store %arg6[%c0_15, %c0_16], %17 {strides = array<i32>} : memref<256x128xf32, #tpu.memory_space<vmem>>, vector<256x128xf32>,
    } else {
    }
    return
  }
  func.func @transform_0(%arg0: i32, %arg1: i32, %arg2: i32) -> (i32, i32) {
    %c0_i32 = arith.constant 0 : i32
    return %arg0, %arg2 : i32, i32
  }
  func.func @transform_1(%arg0: i32, %arg1: i32, %arg2: i32) -> (i32, i32) {
    %c0_i32 = arith.constant 0 : i32
    return %arg2, %arg1 : i32, i32
  }
  func.func @transform_2(%arg0: i32, %arg1: i32, %arg2: i32) -> (i32, i32) {
    %c0_i32 = arith.constant 0 : i32
    %c0_i32_0 = arith.constant 0 : i32
    return %c0_i32, %arg1 : i32, i32
  }
  func.func @transform_3(%arg0: i32, %arg1: i32, %arg2: i32) -> (i32, i32) {
    %c0_i32 = arith.constant 0 : i32
    return %arg0, %arg1 : i32, i32
  }
}

</mosaic_0001>

<bundles_post_ra>
// kernel: conv_bn_relu.1
= control target key start
LH: loop header
LB: loop body
LE: loop exit
PB: predicated region body
PF: predicated region fallthrough
CT: control target
= control target key end

     0   :  { %s1188_s12 = smov 0   ;;  %s1190_s13 = smov 0   ;;  %s1339_s0 = inlined_call_operand.vmem [shape: bf16[512,36], index: 0, kind: input, shape index: {}]   ;;  %s1340_s1 = inlined_call_operand.vmem [shape: bf16[36,128], index: 1, kind: input, shape index: {}]   ;;  %s1341_s2 = inlined_call_operand.vmem [shape: f32[1,128], index: 2, kind: input, shape index: {}]   ;;  %s1342_s3 = inlined_call_operand.vmem [shape: f32[512,128], index: 3, kind: output, shape index: {}]  }
   0x1   :  { %s1192_s14 = smov 0  }
   0x2 LB: > { %s32_s15 = sadd.s32 1, %s1162_s13  ;;  %p993_p0 = scmp.ge.s32.totalorder %s1166_s14, 1  ;;  %s1166_s14 = sphi %s1192_s14, %s13_s14   ;;  %s1162_s13 = sphi %s1190_s13, %s1344_s13   ;;  %s1158_s12 = sphi %s1188_s12, %s1343_s12  }
   0x3   : > { %p34_p1 = scmp.ge.s32.totalorder %s32_s15, 2  ;;  %p188_p2 = scmp.lt.s32.totalorder %s1166_s14, 3 }
   0x5   : > { %s1346_s15 = smov (%p34_p1, %s32_s15), 0  ;;  %p189_p3 = pnand %p993_p0, %p188_p2 }
   0x6   : > { %s994_s20 = sshll.u32 (!%p189_p3), %s1158_s12, 5 }
   0x7   : > { %192 = sbr.rel (%p189_p3) target bundleno = 253 (0xfd), region = 32  ;;  %p230_p4 = scmp.lt.s32.totalorder (!%p189_p3), %s994_s20, 63 }
   0xc   : > { %v1125_v0 = vld [vmem:[%s1340_s1 + $0x10] ss:$0 sps:$4 sm:$0x33]   ;;  %vm509_vm0 = vcmask 1041408   ;;  %v1126_v1 = vld [vmem:[%s1340_s1 + $0x8] sm:$0xff]   ;;  %v1127_v3 = vld [vmem:[%s1340_s1] sm:$0xff]  }
   0xd   : > { %1099 = vmatprep.subr.msk.bf16.mxu0 %vm509_vm0, %v1125_v0  ;;  %1100 = vmatprep.subr.msk.bf16.mxu1 %vm509_vm0, %v1125_v0  ;;  %v511_v2 = vsel %vm509_vm0, %v1125_v0, 0  ;;  %s1348_s20 = smov (!%p230_p4, %s994_s20), 63  ;;  %vm460_vm1 = vcmask 293888   ;;  %v1258_v20 = vld [vmem:[%s1341_s2] ss:$0 sm:$0xff] }
   0xe   : > { %1056 = vmatpush3.bf16.msra.mxu0 %v511_v2  ;;  %1096 = vmatpush3.bf16.msra.mxu1 %v511_v2  ;;  %s995_s23 = sshll.u32 %s1348_s20, 2  ;;  %s997_s29 = sshll.u32 %s1348_s20, 3 }
   0xf   : > { %1057 = vmatprep.subr.bf16.mxu0 %v1126_v1  ;;  %1094 = vmatprep.subr.bf16.mxu1 %v1126_v1  ;;  %s1221_s26 = scalar_lea.vmem %s1339_s0, %s995_s23  ;;  %s1266_s5 = scalar_lea.vmem %s1342_s3, %s997_s29 }
  0x10   : > { %v1128_v4 = vld [vmem:[%s1221_s26] sm:$0xff]   ;;  %v1130_v6 = vld [vmem:[%s1221_s26 + $0x8] sm:$0xff]   ;;  %v1132_v8 = vld [vmem:[%s1221_s26 + $0x10] sm:$0xff]  }
  0x11   : > { %v1129_v5 = vld [vmem:[%s1221_s26 + $0x40] sm:$0xff]   ;;  %1061 = vmatprep.mubr.msk.bf16.mxu0 %vm460_vm1, %v1128_v4  ;;  %v1131_v7 = vld [vmem:[%s1221_s26 + $0x48] sm:$0xff]   ;;  %v1133_v9 = vld [vmem:[%s1221_s26 + $0x50] sm:$0xff]  }
  0x12   : > { %1058 = vmatpush3.bf16.msra.mxu0 %v1126_v1  ;;  %1097 = vmatpush3.bf16.msra.mxu1 %v1126_v1  ;;  %v1134_v10 = vld [vmem:[%s1221_s26 + $0x18] sm:$0xff]   ;;  %v1136_v12 = vld [vmem:[%s1221_s26 + $0x20] sm:$0xff]   ;;  %v1138_v14 = vld [vmem:[%s1221_s26 + $0x28] sm:$0xff]  }
  0x13   : > { %1059 = vmatprep.subr.bf16.mxu0 %v1127_v3  ;;  %1095 = vmatprep.subr.bf16.mxu1 %v1127_v3  ;;  %v1135_v11 = vld [vmem:[%s1221_s26 + $0x58] sm:$0xff]   ;;  %v1137_v13 = vld [vmem:[%s1221_s26 + $0x60] sm:$0xff]   ;;  %v1139_v15 = vld [vmem:[%s1221_s26 + $0x68] sm:$0xff]  }
  0x14   : > { %1077 = vmatprep.mubr.msk.bf16.mxu1 %vm460_vm1, %v1129_v5  ;;  %v1140_v16 = vld [vmem:[%s1221_s26 + $0x30] sm:$0xff]   ;;  %v1142_v18 = vld [vmem:[%s1221_s26 + $0x38] sm:$0xff]  }
  0x15   : > { %v1141_v17 = vld [vmem:[%s1221_s26 + $0x70] sm:$0xff]   ;;  %v1143_v19 = vld [vmem:[%s1221_s26 + $0x78] sm:$0xff]  }
  0x16   : > { %1060 = vmatpush3.bf16.msra.mxu0 %v1127_v3  ;;  %1098 = vmatpush3.bf16.msra.mxu1 %v1127_v3 }
  0x19   : > { %1062 = vmatmul.mubr.msk.bf16.vlgmr.msra.gmra.mxu0 %vm460_vm1, %v1130_v6  ;;  %1078 = vmatmul.mubr.msk.bf16.vlgmr.msra.gmra.mxu1 %vm460_vm1, %v1131_v7 }
  0x1a   : > { %1065 = vmatprep.mubr.msk.bf16.mxu0 %vm460_vm1, %v1132_v8  ;;  %1081 = vmatprep.mubr.msk.bf16.mxu1 %vm460_vm1, %v1133_v9 }
  0x21   : > { %1066 = vmatmul.mubr.msk.bf16.gmra.mxu0 %vm460_vm1, %v1134_v10  ;;  %1082 = vmatmul.mubr.msk.bf16.gmra.mxu1 %vm460_vm1, %v1135_v11 }
  0x22   : > { %1069 = vmatprep.mubr.msk.bf16.mxu0 %vm460_vm1, %v1136_v12  ;;  %1085 = vmatprep.mubr.msk.bf16.mxu1 %vm460_vm1, %v1137_v13 }
  0x29   : > { %1070 = vmatmul.mubr.msk.bf16.gmra.mxu0 %vm460_vm1, %v1138_v14  ;;  %1086 = vmatmul.mubr.msk.bf16.gmra.mxu1 %vm460_vm1, %v1139_v15 }
  0x2a   : > { %1073 = vmatprep.mubr.msk.bf16.mxu0 %vm460_vm1, %v1140_v16  ;;  %1089 = vmatprep.mubr.msk.bf16.mxu1 %vm460_vm1, %v1141_v17 }
  0x31   : > { %1074 = vmatmul.mubr.msk.bf16.gmra.mxu0 %vm460_vm1, %v1142_v18  ;;  %1090 = vmatmul.mubr.msk.bf16.gmra.mxu1 %vm460_vm1, %v1143_v19 }
  0xd9   : > { %v1063_v21 = vpop.f32.mrf.mxu0  ;;  %v1079_v22 = vpop.f32.mrf.mxu1 }
  0xda   : > { %v782_v23 = vadd.f32 %v1063_v21, %v1258_v20  ;;  %v798_v24 = vadd.f32 %v1079_v22, %v1258_v20 }
  0xdb   : > { %v547_v25 = vpop.f32.mrf.mxu0  ;;  %v611_v26 = vpop.f32.mrf.mxu1 }
  0xdc   : > { %v814_v27 = vmax.f32 %v782_v23, 0.0  ;;  %v830_v28 = vmax.f32 %v798_v24, 0.0  ;;  %v780_v29 = vadd.f32 %v1258_v20, %v547_v25  ;;  %v796_v30 = vadd.f32 %v1258_v20, %v611_v26 }
  0xdd   : > { %v1064_v31 = vpop.f32.mrf.mxu0  ;;  %v1080_v32 = vpop.f32.mrf.mxu1 }
  0xde   : > { %846 = vst [vmem:[%s1266_s5 + $0x10] sm:$0xff] %v814_v27  ;;  %862 = vst [vmem:[%s1266_s5 + $0x90] sm:$0xff] %v830_v28  ;;  %v812_v33 = vmax.f32 %v780_v29, 0.0  ;;  %v828_v34 = vmax.f32 %v796_v30, 0.0  ;;  %v783_v35 = vadd.f32 %v1064_v31, %v1258_v20  ;;  %v799_v36 = vadd.f32 %v1080_v32, %v1258_v20 }
  0xdf   : > { %v550_v37 = vpop.f32.mrf.mxu0  ;;  %v614_v38 = vpop.f32.mrf.mxu1 }
  0xe0   : > { %844 = vst [vmem:[%s1266_s5] sm:$0xff] %v812_v33  ;;  %860 = vst [vmem:[%s1266_s5 + $0x80] sm:$0xff] %v828_v34  ;;  %v815_v39 = vmax.f32 %v783_v35, 0.0  ;;  %v831_v40 = vmax.f32 %v799_v36, 0.0  ;;  %v781_v41 = vadd.f32 %v1258_v20, %v550_v37  ;;  %v797_v42 = vadd.f32 %v1258_v20, %v614_v38 }
  0xe1   : > { %v1067_v43 = vpop.f32.mrf.mxu0  ;;  %v1083_v44 = vpop.f32.mrf.mxu1 }
  0xe2   : > { %847 = vst [vmem:[%s1266_s5 + $0x18] sm:$0xff] %v815_v39  ;;  %863 = vst [vmem:[%s1266_s5 + $0x98] sm:$0xff] %v831_v40  ;;  %v813_v45 = vmax.f32 %v781_v41, 0.0  ;;  %v829_v46 = vmax.f32 %v797_v42, 0.0  ;;  %v786_v47 = vadd.f32 %v1067_v43, %v1258_v20  ;;  %v802_v48 = vadd.f32 %v1083_v44, %v1258_v20 }
  0xe3   : > { %v563_v49 = vpop.f32.mrf.mxu0  ;;  %v627_v50 = vpop.f32.mrf.mxu1 }
  0xe4   : > { %845 = vst [vmem:[%s1266_s5 + $0x8] sm:$0xff] %v813_v45  ;;  %861 = vst [vmem:[%s1266_s5 + $0x88] sm:$0xff] %v829_v46  ;;  %v818_v51 = vmax.f32 %v786_v47, 0.0  ;;  %v834_v52 = vmax.f32 %v802_v48, 0.0  ;;  %v784_v53 = vadd.f32 %v1258_v20, %v563_v49  ;;  %v800_v54 = vadd.f32 %v1258_v20, %v627_v50 }
  0xe5   : > { %v1068_v55 = vpop.f32.mrf.mxu0  ;;  %v1084_v56 = vpop.f32.mrf.mxu1 }
  0xe6   : > { %850 = vst [vmem:[%s1266_s5 + $0x30] sm:$0xff] %v818_v51  ;;  %866 = vst [vmem:[%s1266_s5 + $0xb0] sm:$0xff] %v834_v52  ;;  %v816_v57 = vmax.f32 %v784_v53, 0.0  ;;  %v832_v58 = vmax.f32 %v800_v54, 0.0  ;;  %v787_v59 = vadd.f32 %v1068_v55, %v1258_v20  ;;  %v803_v60 = vadd.f32 %v1084_v56, %v1258_v20 }
  0xe7   : > { %v566_v61 = vpop.f32.mrf.mxu0  ;;  %v630_v62 = vpop.f32.mrf.mxu1 }
  0xe8   : > { %848 = vst [vmem:[%s1266_s5 + $0x20] sm:$0xff] %v816_v57  ;;  %864 = vst [vmem:[%s1266_s5 + $0xa0] sm:$0xff] %v832_v58  ;;  %v819_v63 = vmax.f32 %v787_v59, 0.0  ;;  %v835_v0 = vmax.f32 %v803_v60, 0.0  ;;  %v785_v1 = vadd.f32 %v1258_v20, %v566_v61  ;;  %v801_v2 = vadd.f32 %v1258_v20, %v630_v62 }
  0xe9   : > { %v1071_v3 = vpop.f32.mrf.mxu0  ;;  %v1087_v4 = vpop.f32.mrf.mxu1 }
  0xea   : > { %851 = vst [vmem:[%s1266_s5 + $0x38] sm:$0xff] %v819_v63  ;;  %867 = vst [vmem:[%s1266_s5 + $0xb8] sm:$0xff] %v835_v0  ;;  %v817_v5 = vmax.f32 %v785_v1, 0.0  ;;  %v833_v6 = vmax.f32 %v801_v2, 0.0  ;;  %v790_v7 = vadd.f32 %v1071_v3, %v1258_v20  ;;  %v806_v8 = vadd.f32 %v1087_v4, %v1258_v20 }
  0xeb   : > { %v579_v9 = vpop.f32.mrf.mxu0  ;;  %v643_v10 = vpop.f32.mrf.mxu1 }
  0xec   : > { %849 = vst [vmem:[%s1266_s5 + $0x28] sm:$0xff] %v817_v5  ;;  %865 = vst [vmem:[%s1266_s5 + $0xa8] sm:$0xff] %v833_v6  ;;  %v822_v11 = vmax.f32 %v790_v7, 0.0  ;;  %v838_v12 = vmax.f32 %v806_v8, 0.0  ;;  %v788_v13 = vadd.f32 %v1258_v20, %v579_v9  ;;  %v804_v14 = vadd.f32 %v1258_v20, %v643_v10 }
  0xed   : > { %v1072_v15 = vpop.f32.mrf.mxu0  ;;  %v1088_v16 = vpop.f32.mrf.mxu1 }
  0xee   : > { %854 = vst [vmem:[%s1266_s5 + $0x50] sm:$0xff] %v822_v11  ;;  %870 = vst [vmem:[%s1266_s5 + $0xd0] sm:$0xff] %v838_v12  ;;  %v820_v17 = vmax.f32 %v788_v13, 0.0  ;;  %v836_v18 = vmax.f32 %v804_v14, 0.0  ;;  %v791_v19 = vadd.f32 %v1072_v15, %v1258_v20  ;;  %v807_v21 = vadd.f32 %v1088_v16, %v1258_v20 }
  0xef   : > { %v582_v22 = vpop.f32.mrf.mxu0  ;;  %v646_v23 = vpop.f32.mrf.mxu1 }
  0xf0   : > { %852 = vst [vmem:[%s1266_s5 + $0x40] sm:$0xff] %v820_v17  ;;  %868 = vst [vmem:[%s1266_s5 + $0xc0] sm:$0xff] %v836_v18  ;;  %v823_v24 = vmax.f32 %v791_v19, 0.0  ;;  %v839_v25 = vmax.f32 %v807_v21, 0.0  ;;  %v789_v26 = vadd.f32 %v1258_v20, %v582_v22  ;;  %v805_v27 = vadd.f32 %v1258_v20, %v646_v23 }
  0xf1   : > { %v1075_v28 = vpop.f32.mrf.mxu0  ;;  %v1091_v29 = vpop.f32.mrf.mxu1 }
  0xf2   : > { %855 = vst [vmem:[%s1266_s5 + $0x58] sm:$0xff] %v823_v24  ;;  %871 = vst [vmem:[%s1266_s5 + $0xd8] sm:$0xff] %v839_v25  ;;  %v821_v30 = vmax.f32 %v789_v26, 0.0  ;;  %v837_v31 = vmax.f32 %v805_v27, 0.0  ;;  %v794_v32 = vadd.f32 %v1075_v28, %v1258_v20  ;;  %v810_v33 = vadd.f32 %v1091_v29, %v1258_v20 }
  0xf3   : > { %v595_v34 = vpop.f32.mrf.mxu0  ;;  %v659_v35 = vpop.f32.mrf.mxu1 }
  0xf4   : > { %853 = vst [vmem:[%s1266_s5 + $0x48] sm:$0xff] %v821_v30  ;;  %869 = vst [vmem:[%s1266_s5 + $0xc8] sm:$0xff] %v837_v31  ;;  %v826_v36 = vmax.f32 %v794_v32, 0.0  ;;  %v842_v37 = vmax.f32 %v810_v33, 0.0  ;;  %v792_v38 = vadd.f32 %v1258_v20, %v595_v34  ;;  %v808_v39 = vadd.f32 %v1258_v20, %v659_v35 }
  0xf5   : > { %v1076_v40 = vpop.f32.mrf.mxu0  ;;  %v1092_v41 = vpop.f32.mrf.mxu1 }
  0xf6   : > { %858 = vst [vmem:[%s1266_s5 + $0x70] sm:$0xff] %v826_v36  ;;  %874 = vst [vmem:[%s1266_s5 + $0xf0] sm:$0xff] %v842_v37  ;;  %v824_v42 = vmax.f32 %v792_v38, 0.0  ;;  %v840_v43 = vmax.f32 %v808_v39, 0.0  ;;  %v795_v44 = vadd.f32 %v1076_v40, %v1258_v20  ;;  %v811_v45 = vadd.f32 %v1092_v41, %v1258_v20 }
  0xf7   : > { %v598_v46 = vpop.f32.mrf.mxu0  ;;  %v662_v47 = vpop.f32.mrf.mxu1 }
  0xf8   : > { %856 = vst [vmem:[%s1266_s5 + $0x60] sm:$0xff] %v824_v42  ;;  %872 = vst [vmem:[%s1266_s5 + $0xe0] sm:$0xff] %v840_v43  ;;  %v827_v48 = vmax.f32 %v795_v44, 0.0  ;;  %v843_v49 = vmax.f32 %v811_v45, 0.0  ;;  %v793_v50 = vadd.f32 %v1258_v20, %v598_v46  ;;  %v809_v51 = vadd.f32 %v1258_v20, %v662_v47 }
  0xfa   : > { %859 = vst [vmem:[%s1266_s5 + $0x78] sm:$0xff] %v827_v48  ;;  %875 = vst [vmem:[%s1266_s5 + $0xf8] sm:$0xff] %v843_v49  ;;  %v825_v52 = vmax.f32 %v793_v50, 0.0  ;;  %v841_v53 = vmax.f32 %v809_v51, 0.0 }
  0xfc   : > { %857 = vst [vmem:[%s1266_s5 + $0x68] sm:$0xff] %v825_v52  ;;  %873 = vst [vmem:[%s1266_s5 + $0xe8] sm:$0xff] %v841_v53 }
  0xfd PF: > { %s13_s14 = sadd.s32 1, %s1166_s14   ;;  %s1343_s12 = smov %s1162_s13 }
  0xfe   : > { %p10_p5 = scmp.ge.s32.totalorder %s13_s14, 4   ;;  %s1344_s13 = smov %s1346_s15 }
 0x100   :  { %12 = sbr.rel (!%p10_p5) target bundleno = 2 (0x2), region = 76 }

</bundles_post_ra>
